<compile_context>
chip_gen: v6e
topology: v6e:2x2x1
jax: 0.10.0
libtpu: 0.0.40
codegen_flags: <defaults>
</compile_context>

<pallas_src>
import functools

import jax
import jax.numpy as jnp
from jax import lax
from jax.experimental import pallas as pl
from jax.experimental.pallas import tpu as pltpu
import numpy as np


def _nbytes(shape, dtype):
    return int(np.prod(shape)) * jnp.dtype(dtype).itemsize


# --------------------------- kernel A: conv stack ----------------------------
def _conv_kernel(xt_ref, w1_ref, b1_ref, w2_ref, b2_ref, y2_ref, st_ref):
    # xt_ref : (bt, L2, 6V)   compute dtype  tap-concatenated input rows
    # w1_ref : (6V, 128)      compute dtype  block-diag conv1 weight -> [even|odd]
    # b1_ref : (1, 128)       f32            [b1 | b1]
    # w2_ref : (256, 128)     compute dtype  conv2: [t1 ; t2 ; 0 ; t0]
    # b2_ref : (1, 128)       f32
    # y2_ref : (bt, L2, 128)  y2 dtype       conv2 pre-BN output (bf16 fast path)
    # st_ref : (1, 2, 128)    f32            per-tile [sum ; sum of squares]
    x = xt_ref[...]

    # conv1: one MXU matmul producing lane-packed [even | odd] (128 lanes).
    y1 = lax.dot_general(x, w1_ref[...],
                         dimension_numbers=(((2,), (0,)), ((), ())),
                         preferred_element_type=jnp.float32)
    y1 = y1 + b1_ref[...][None]
    y1 = jnp.where(y1 > 0, y1, 0.2 * y1)            # LeakyReLU(0.2), lane dense
    y1 = y1.astype(w2_ref.dtype)
    bt, l2, c = y1.shape

    # conv2: single K=256 contraction.  Operand lanes [0:128] are y1
    # (taps 1,2 on [even|odd] of the same output row); lanes [128:256] are y1
    # shifted down one row (tap 0 consumes odd[u-1]; row 0 sees the zero
    # padding).  The shift is built in registers -- no scratch buffer, no
    # masked partial-sublane stores, no output-ref re-read.
    zero_row = jnp.zeros((bt, 1, c), y1.dtype)
    if l2 > 1:
        y1_shift = jnp.concatenate([zero_row, y1[:, :l2 - 1, :]], axis=1)
    else:
        y1_shift = zero_row
    y1_cat = jnp.concatenate([y1, y1_shift], axis=-1)            # (bt, l2, 256)
    acc = lax.dot_general(y1_cat, w2_ref[...],
                          dimension_numbers=(((2,), (0,)), ((), ())),
                          preferred_element_type=jnp.float32)
    acc = acc + b2_ref[...][None]

    # Per-tile BatchNorm partials from the in-register f32 value (single pass),
    # written with ONE store.  (Variance is clamped >= 0 outside the kernel.)
    s1 = jnp.sum(jnp.sum(acc, axis=1, keepdims=True), axis=0, keepdims=True)
    s2 = jnp.sum(jnp.sum(acc * acc, axis=1, keepdims=True), axis=0, keepdims=True)
    st_ref[...] = jnp.concatenate([s1, s2], axis=1)

    # Single full-tile store of the activation (bf16 on the fast path).
    y2_ref[...] = acc.astype(y2_ref.dtype)


# ----------------------- kernel B: BN + LeakyReLU + fc -----------------------
def _head_kernel(y2_ref, scale_ref, shift_ref, wfc_ref, o_ref):
    # y2_ref      : (bt, L2, 128) y2 dtype
    # scale/shift : (1, 128)      f32   folded BN affine
    # wfc_ref     : (L2, 128)     f32   fc weight aligned to the (L2, C) layout
    # o_ref       : (bt, 1, 128)  f32   per-lane partial fc sums (reduced outside)
    a = y2_ref[...].astype(jnp.float32)
    a = a * scale_ref[...][None] + shift_ref[...][None]
    a = jnp.where(a > 0, a, 0.2 * a)
    # fc partial stays on the VPU + sublane reduce: an N=1 MXU matmul would use
    # 1/128 output lanes and this kernel is HBM-read bound on y2 anyway.
    o_ref[...] = jnp.sum(a * wfc_ref[...][None], axis=1, keepdims=True)


# ----------------------------- batch-tile picker ------------------------------
def _auto_batch_tile(B, L2, per_b_bytes, tile_budget_bytes):
    """Largest divisor of B whose VMEM tile footprint fits the budget, with a
    preference for nb >= 2 (v7x dual TensorCore) when the half tile still
    gives the MXU >= 128 rows."""
    cap = max(1, tile_budget_bytes // max(per_b_bytes, 1))
    bt = 1
    for d in range(1, B + 1):
        if B % d == 0 and d <= cap:
            bt = d
    if bt == B and B > 1:
        for d in range(B // 2, 0, -1):
            if B % d == 0:
                if d * L2 >= 128:
                    bt = d
                break
    return bt


# --------------------------------- wrapper -----------------------------------
@functools.partial(jax.jit, static_argnames=("compute_dtype", "batch_tile"))
def discriminator_forward(x, params, *, compute_dtype=jnp.bfloat16,
                          batch_tile=None):
    """x: (B, vocab_size, seq_len) float32, NCL like PyTorch."""
    B, V, L = x.shape
    assert L % 4 == 0, "seq_len must be divisible by 4"
    L2 = L // 4
    dt = compute_dtype
    f32 = jnp.float32
    # Inter-kernel activation dtype: bf16 on the fast path halves the dominant
    # HBM traffic (y2 is written by kernel A, read by kernel B); the f32
    # exact-math path keeps f32 so the 1e-3 check stays meaningful.
    y2_dt = dt
    dtb = jnp.dtype(dt).itemsize
    y2b = jnp.dtype(y2_dt).itemsize

    # ---- VMEM-budgeted batch tile (per-batch-element bytes, kernel A) -------
    per_b = (2 * L2 * 6 * V * dtb            # x_taps tile, double-buffered
             + 2 * L2 * 128 * y2b            # y2 out tile, double-buffered
             + 2 * L2 * 128 * 4              # y1 + acc f32 intermediates
             + L2 * (256 + 128) * dtb)       # y1_cat / y1_shift staging
    if batch_tile is None:
        bt = _auto_batch_tile(B, L2, per_b, 24 << 20)
    else:
        bt = batch_tile
    assert B % bt == 0, "batch must be divisible by batch_tile"
    nb = B // bt

    # ---- single fused input rearrangement (transpose + pad + tap concat) ----
    # x_taps[b, s, :] = [xp[4s], xp[4s+1], xp[4s+2],   (even conv1-output taps)
    #                    xp[4s+2], xp[4s+3], xp[4s+4]] (odd  conv1-output taps)
    # built from two contiguous reshapes of the padded sequence (not 6 strided
    # gathers).  Right padding is 3 rows only to make the second reshape legal;
    # the extra zero rows never reach kept lanes.
    x_nlc = jnp.transpose(x, (0, 2, 1)).astype(f32)              # (B, L, V)
    x_pad = jnp.pad(x_nlc, ((0, 0), (1, 3), (0, 0)))             # (B, L+4, V)
    x4a = x_pad[:, :4 * L2, :].reshape(B, L2, 4 * V)             # xp[4s..4s+3]
    x4b = x_pad[:, 4:4 * L2 + 4, :].reshape(B, L2, 4 * V)        # xp[4s+4..]
    x_taps = jnp.concatenate(
        [x4a[:, :, :3 * V], x4a[:, :, 2 * V:], x4b[:, :, :V]],
        axis=-1).astype(dt)                                      # (B, L2, 6V)

    # ---- conv1 weight: block-diagonal so one matmul gives [even | odd] ------
    w1cat = jnp.transpose(params["w1"], (2, 1, 0)).reshape(3 * V, 64)
    zpad = jnp.zeros((3 * V, 64), f32)
    w1bd = jnp.concatenate(
        [jnp.concatenate([w1cat, zpad], axis=1),
         jnp.concatenate([zpad, w1cat], axis=1)], axis=0).astype(dt)  # (6V,128)
    b1p = jnp.concatenate([params["b1"], params["b1"]]).reshape(1, 128).astype(f32)

    # ---- conv2: stacked (256, 128) weight on [y1 | row-shifted y1] -----------
    t0 = params["w2"][:, :, 0].T                                  # (64, 128)
    t1 = params["w2"][:, :, 1].T
    t2 = params["w2"][:, :, 2].T
    w2s = jnp.concatenate(
        [t1, t2, jnp.zeros((64, 128), f32), t0], axis=0).astype(dt)  # (256,128)
    b2 = params["b2"].reshape(1, 128).astype(f32)

    # ---- kernel A: exact VMEM accounting, capped at 48 MiB -------------------
    w_bytes_a = (_nbytes((6 * V, 128), dt) + _nbytes((256, 128), dt)
                 + 2 * _nbytes((1, 128), f32))
    vmem_a = int(min(48 << 20, max(8 << 20,
                                   bt * per_b
                                   + 2 * _nbytes((1, 2, 128), f32)
                                   + 2 * w_bytes_a + (2 << 20))))
    cost_a = pl.CostEstimate(
        flops=int(2 * B * L2 * 128 * (6 * V + 256) + 16 * B * L2 * 128),
        transcendentals=0,
        bytes_accessed=int(_nbytes((B, L2, 6 * V), dt) + w_bytes_a +
                           _nbytes((B, L2, 128), y2_dt) +
                           _nbytes((nb, 2, 128), f32)))

    y2, stats = pl.pallas_call(
        _conv_kernel,
        out_shape=(jax.ShapeDtypeStruct((B, L2, 128), y2_dt),
                   jax.ShapeDtypeStruct((nb, 2, 128), f32)),
        grid=(nb,),
        in_specs=[
            pl.BlockSpec((bt, L2, 6 * V), lambda b: (b, 0, 0)),
            pl.BlockSpec((6 * V, 128), lambda b: (0, 0)),
            pl.BlockSpec((1, 128), lambda b: (0, 0)),
            pl.BlockSpec((256, 128), lambda b: (0, 0)),
            pl.BlockSpec((1, 128), lambda b: (0, 0)),
        ],
        out_specs=(
            pl.BlockSpec((bt, L2, 128), lambda b: (b, 0, 0)),
            pl.BlockSpec((1, 2, 128), lambda b: (b, 0, 0)),
        ),
        compiler_params=pltpu.CompilerParams(
            dimension_semantics=("parallel",), vmem_limit_bytes=vmem_a),
        cost_estimate=cost_a,
    )(x_taps, w1bd, b1p, w2s, b2)

    # ---- global training-mode BatchNorm statistics, folded into scale/shift -
    tot = jnp.sum(stats, axis=0)                  # (2, 128) f32
    cnt = float(B * L2)
    mean = tot[0] / cnt
    # TODO(synk): single-pass E[x^2]-E[x]^2 can cancel for very large B*L2;
    # switch to a shifted/two-pass variance if batch sizes grow.  Clamp >= 0.
    var = jnp.maximum(tot[1] / cnt - mean * mean, 0.0)
    inv = lax.rsqrt(var + 1e-5)
    scale = (params["gamma"] * inv).reshape(1, 128).astype(f32)
    shift = (params["beta"] - mean * params["gamma"] * inv).reshape(1, 128).astype(f32)

    # fc weight rearranged to the (L2, C) activation layout
    # (PyTorch flattens (B, 128, L2) as index c*L2 + l).
    wfc = params["wfc"].reshape(128, L2).T.astype(f32)            # (L2, 128)

    # ---- kernel B: folded BN + LeakyReLU + fc partial ------------------------
    w_bytes_b = _nbytes((L2, 128), f32) + 2 * _nbytes((1, 128), f32)
    vmem_b = int(min(48 << 20, max(8 << 20,
                                   bt * (2 * L2 * 128 * y2b + L2 * 128 * 4
                                         + 2 * 128 * 4)
                                   + 2 * w_bytes_b + (2 << 20))))
    cost_b = pl.CostEstimate(
        flops=int(6 * B * L2 * 128),
        transcendentals=0,
        bytes_accessed=int(_nbytes((B, L2, 128), y2_dt) + w_bytes_b +
                           _nbytes((B, 1, 128), f32)))

    partial = pl.pallas_call(
        _head_kernel,
        out_shape=jax.ShapeDtypeStruct((B, 1, 128), f32),
        grid=(nb,),
        in_specs=[
            pl.BlockSpec((bt, L2, 128), lambda b: (b, 0, 0)),
            pl.BlockSpec((1, 128), lambda b: (0, 0)),
            pl.BlockSpec((1, 128), lambda b: (0, 0)),
            pl.BlockSpec((L2, 128), lambda b: (0, 0)),
        ],
        out_specs=pl.BlockSpec((bt, 1, 128), lambda b: (b, 0, 0)),
        compiler_params=pltpu.CompilerParams(
            dimension_semantics=("parallel",), vmem_limit_bytes=vmem_b),
        cost_estimate=cost_b,
    )(y2, scale, shift, wfc)

    # final cross-lane reduction + fc bias (tiny (B, 128) -> (B, 1) epilogue)
    return jnp.sum(partial, axis=2) + params["bfc"].reshape(1, 1)


# --------------------------- parameter init ----------------------------------
def _spectral_normalize(w, key, n_iter=8, eps=1e-12):
    """Spectral norm a la nn.utils.parametrizations.spectral_norm (dim=0)."""
    w_mat = w.reshape(w.shape[0], -1)
    u = jax.random.normal(key, (w_mat.shape[0],), jnp.float32)
    u = u / (jnp.linalg.norm(u) + eps)
    v = None
    for _ in range(n_iter):
        v = w_mat.T @ u
        v = v / (jnp.linalg.norm(v) + eps)
        u = w_mat @ v
        u = u / (jnp.linalg.norm(u) + eps)
    sigma = u @ (w_mat @ v)
    return w / sigma


def init_params(key, seq_len, vocab_size):
    ks = jax.random.split(key, 9)
    w1 = jax.random.normal(ks[0], (64, vocab_size, 3), jnp.float32) * 0.10
    b1 = jax.random.normal(ks[1], (64,), jnp.float32) * 0.10
    w2 = jax.random.normal(ks[2], (128, 64, 3), jnp.float32) * 0.05
    b2 = jax.random.normal(ks[3], (128,), jnp.float32) * 0.05
    gamma = jnp.ones((128,), jnp.float32)
    beta = jnp.zeros((128,), jnp.float32)
    fc_in = 128 * seq_len // 4
    wfc = jax.random.normal(ks[4], (1, fc_in), jnp.float32) * 0.05
    bfc = jax.random.normal(ks[5], (1,), jnp.float32) * 0.05
    # spectral norm (deterministic power iteration) on conv1/conv2/fc weights
    w1 = _spectral_normalize(w1, ks[6])
    w2 = _spectral_normalize(w2, ks[7])
    wfc = _spectral_normalize(wfc, ks[8])
    return dict(w1=w1, b1=b1, w2=w2, b2=b2, gamma=gamma, beta=beta,
                wfc=wfc, bfc=bfc)


# ------------------------- pure-JAX reference --------------------------------
def reference_forward(x, params):
    dn = ("NCH", "OIH", "NCH")
    y = lax.conv_general_dilated(x, params["w1"], window_strides=(2,),
                                 padding=[(1, 1)], dimension_numbers=dn)
    y = y + params["b1"][None, :, None]
    y = jnp.where(y > 0, y, 0.2 * y)
    y = lax.conv_general_dilated(y, params["w2"], window_strides=(2,),
                                 padding=[(1, 1)], dimension_numbers=dn)
    y = y + params["b2"][None, :, None]
    mean = jnp.mean(y, axis=(0, 2), keepdims=True)
    var = jnp.mean((y - mean) ** 2, axis=(0, 2), keepdims=True)
    y = (y - mean) / jnp.sqrt(var + 1e-5)
    y = y * params["gamma"][None, :, None] + params["beta"][None, :, None]
    y = jnp.where(y > 0, y, 0.2 * y)
    flat = y.reshape(y.shape[0], -1)
    return flat @ params["wfc"].T + params["bfc"][None, :]


# --------------------------------- main ---------------------------------------
if __name__ == "__main__":
    seq_len = 16
    vocab_size = 8
    batch = 8

    key = jax.random.PRNGKey(0)
    kx, kp = jax.random.split(key)
    x = jax.random.normal(kx, (batch, vocab_size, seq_len), jnp.float32)
    params = init_params(kp, seq_len, vocab_size)

    ref = jax.block_until_ready(reference_forward(x, params))

    # exact-math (f32) path, auto batch tile: must match the PyTorch-equivalent
    # reference at 1e-3
    out_f32 = jax.block_until_ready(
        discriminator_forward(x, params, compute_dtype=jnp.float32))
    np.testing.assert_allclose(np.asarray(out_f32), np.asarray(ref),
                               atol=1e-3, rtol=1e-3)

    # fast path: bf16 MXU operands + bf16 inter-kernel activation, f32
    # accumulation / BN / fc.  Explicit smaller batch tile exercises the
    # multi-step gridded path (nb = 4).
    out_bf16 = jax.block_until_ready(
        discriminator_forward(x, params, compute_dtype=jnp.bfloat16,
                              batch_tile=2))
    np.testing.assert_allclose(np.asarray(out_bf16), np.asarray(ref),
                               atol=2e-2, rtol=2e-2)

    print("KERNEL_OK")
</pallas_src>

<mosaic_0001>
module attributes {stable_mosaic.version = 11 : i64} {
  func.func @_conv_kernel(%arg0: i32, %arg1: memref<8x4x48xf32, #tpu.memory_space<vmem>>, %arg2: memref<48x128xf32, #tpu.memory_space<vmem>>, %arg3: memref<1x128xf32, #tpu.memory_space<vmem>>, %arg4: memref<256x128xf32, #tpu.memory_space<vmem>>, %arg5: memref<1x128xf32, #tpu.memory_space<vmem>>, %arg6: memref<8x4x128xf32, #tpu.memory_space<vmem>>, %arg7: memref<1x2x128xf32, #tpu.memory_space<vmem>>) attributes {dimension_semantics = [#tpu.dimension_semantics<parallel>], iteration_bounds = array<i64: 1>, scalar_prefetch = 0 : i64, scratch_operands = 0 : i64, tpu.core_type = #tpu.core_type<tc>, window_params = [{transform_indices = @transform_0, window_bounds = array<i64: 8, 4, 48>}, {pipeline_mode = #tpu.pipeline_mode<synchronous>, transform_indices = @transform_1, window_bounds = array<i64: 48, 128>}, {pipeline_mode = #tpu.pipeline_mode<synchronous>, transform_indices = @transform_2, window_bounds = array<i64: 1, 128>}, {pipeline_mode = #tpu.pipeline_mode<synchronous>, transform_indices = @transform_3, window_bounds = array<i64: 256, 128>}, {pipeline_mode = #tpu.pipeline_mode<synchronous>, transform_indices = @transform_4, window_bounds = array<i64: 1, 128>}, {transform_indices = @transform_5, window_bounds = array<i64: 8, 4, 128>}, {transform_indices = @transform_6, window_bounds = array<i64: 1, 2, 128>}]} {
    %c0 = arith.constant 0 : index
    %c0_0 = arith.constant 0 : index
    %c0_1 = arith.constant 0 : index
    %0 = vector.load %arg1[%c0, %c0_0, %c0_1] : memref<8x4x48xf32, #tpu.memory_space<vmem>>, vector<8x4x48xf32>
    %c0_2 = arith.constant 0 : index
    %c0_3 = arith.constant 0 : index
    %1 = vector.load %arg2[%c0_2, %c0_3] : memref<48x128xf32, #tpu.memory_space<vmem>>, vector<48x128xf32>
    %cst = arith.constant dense<0.000000e+00> : vector<8x4x128xf32>
    %2 = tpu.matmul %0, %1, %cst {dimension_numbers = #tpu.dot_dimension_numbers<[2], [0], [0, 1], [1], [0, 0, 0, 1, 1, 1], [], []>} : vector<8x4x48xf32>, vector<48x128xf32>, vector<8x4x128xf32> -> vector<8x4x128xf32>
    %c0_4 = arith.constant 0 : index
    %c0_5 = arith.constant 0 : index
    %3 = vector.load %arg3[%c0_4, %c0_5] : memref<1x128xf32, #tpu.memory_space<vmem>>, vector<1x128xf32>
    %4 = vector.shape_cast %3 : vector<1x128xf32> to vector<1x1x128xf32>
    %5 = vector.broadcast %4 : vector<1x1x128xf32> to vector<8x4x128xf32>
    %6 = arith.addf %2, %5 : vector<8x4x128xf32>
    %cst_6 = arith.constant 0.000000e+00 : f32
    %7 = vector.broadcast %cst_6 : f32 to vector<8x4x128xf32>
    %8 = arith.cmpf ogt, %6, %7 : vector<8x4x128xf32>
    %cst_7 = arith.constant 2.000000e-01 : f32
    %9 = vector.broadcast %cst_7 : f32 to vector<8x4x128xf32>
    %10 = arith.mulf %9, %6 : vector<8x4x128xf32>
    %11 = arith.select %8, %6, %10 : vector<8x4x128xi1>, vector<8x4x128xf32>
    %cst_8 = arith.constant 0.000000e+00 : f32
    %12 = vector.broadcast %cst_8 : f32 to vector<8x1x128xf32>
    %13 = vector.extract_strided_slice %11 {offsets = [0, 0, 0], sizes = [8, 3, 128], strides = [1, 1, 1]} : vector<8x4x128xf32> to vector<8x3x128xf32>
    %14 = tpu.concatenate %12, %13 in 1 : vector<8x1x128xf32>, vector<8x3x128xf32> -> vector<8x4x128xf32>
    %15 = tpu.concatenate %11, %14 in 2 : vector<8x4x128xf32>, vector<8x4x128xf32> -> vector<8x4x256xf32>
    %c0_9 = arith.constant 0 : index
    %c0_10 = arith.constant 0 : index
    %16 = vector.load %arg4[%c0_9, %c0_10] : memref<256x128xf32, #tpu.memory_space<vmem>>, vector<256x128xf32>
    %cst_11 = arith.constant dense<0.000000e+00> : vector<8x4x128xf32>
    %17 = tpu.matmul %15, %16, %cst_11 {dimension_numbers = #tpu.dot_dimension_numbers<[2], [0], [0, 1], [1], [0, 0, 0, 1, 1, 1], [], []>} : vector<8x4x256xf32>, vector<256x128xf32>, vector<8x4x128xf32> -> vector<8x4x128xf32>
    %c0_12 = arith.constant 0 : index
    %c0_13 = arith.constant 0 : index
    %18 = vector.load %arg5[%c0_12, %c0_13] : memref<1x128xf32, #tpu.memory_space<vmem>>, vector<1x128xf32>
    %19 = vector.shape_cast %18 : vector<1x128xf32> to vector<1x1x128xf32>
    %20 = vector.broadcast %19 : vector<1x1x128xf32> to vector<8x4x128xf32>
    %21 = arith.addf %17, %20 : vector<8x4x128xf32>
    %cst_14 = arith.constant dense<0.000000e+00> : vector<8x128xf32>
    %22 = vector.multi_reduction <add>, %21, %cst_14 [1] : vector<8x4x128xf32> to vector<8x128xf32>
    %23 = vector.shape_cast %22 : vector<8x128xf32> to vector<8x1x128xf32>
    %cst_15 = arith.constant dense<0.000000e+00> : vector<1x128xf32>
    %24 = vector.multi_reduction <add>, %23, %cst_15 [0] : vector<8x1x128xf32> to vector<1x128xf32>
    %25 = vector.shape_cast %24 : vector<1x128xf32> to vector<1x1x128xf32>
    %26 = arith.mulf %21, %21 : vector<8x4x128xf32>
    %cst_16 = arith.constant dense<0.000000e+00> : vector<8x128xf32>
    %27 = vector.multi_reduction <add>, %26, %cst_16 [1] : vector<8x4x128xf32> to vector<8x128xf32>
    %28 = vector.shape_cast %27 : vector<8x128xf32> to vector<8x1x128xf32>
    %cst_17 = arith.constant dense<0.000000e+00> : vector<1x128xf32>
    %29 = vector.multi_reduction <add>, %28, %cst_17 [0] : vector<8x1x128xf32> to vector<1x128xf32>
    %30 = vector.shape_cast %29 : vector<1x128xf32> to vector<1x1x128xf32>
    %31 = tpu.concatenate %25, %30 in 1 : vector<1x1x128xf32>, vector<1x1x128xf32> -> vector<1x2x128xf32>
    %c0_18 = arith.constant 0 : index
    %c0_19 = arith.constant 0 : index
    %c0_20 = arith.constant 0 : index
    %32 = vector.load %arg7[%c0_18, %c0_19, %c0_20] : memref<1x2x128xf32, #tpu.memory_space<vmem>>, vector<1x2x128xf32>
    tpu.vector_store %arg7[%c0_18, %c0_19, %c0_20], %31 {strides = array<i32>} : memref<1x2x128xf32, #tpu.memory_space<vmem>>, vector<1x2x128xf32>,
    %c0_21 = arith.constant 0 : index
    %c0_22 = arith.constant 0 : index
    %c0_23 = arith.constant 0 : index
    %33 = vector.load %arg6[%c0_21, %c0_22, %c0_23] : memref<8x4x128xf32, #tpu.memory_space<vmem>>, vector<8x4x128xf32>
    tpu.vector_store %arg6[%c0_21, %c0_22, %c0_23], %21 {strides = array<i32>} : memref<8x4x128xf32, #tpu.memory_space<vmem>>, vector<8x4x128xf32>,
    return
  }
  func.func @transform_0(%arg0: i32) -> (i32, i32, i32) {
    %c0_i32 = arith.constant 0 : i32
    %c0_i32_0 = arith.constant 0 : i32
    %c0_i32_1 = arith.constant 0 : i32
    return %arg0, %c0_i32, %c0_i32_0 : i32, i32, i32
  }
  func.func @transform_1(%arg0: i32) -> (i32, i32) {
    %c0_i32 = arith.constant 0 : i32
    %c0_i32_0 = arith.constant 0 : i32
    %c0_i32_1 = arith.constant 0 : i32
    return %c0_i32, %c0_i32_0 : i32, i32
  }
  func.func @transform_2(%arg0: i32) -> (i32, i32) {
    %c0_i32 = arith.constant 0 : i32
    %c0_i32_0 = arith.constant 0 : i32
    %c0_i32_1 = arith.constant 0 : i32
    return %c0_i32, %c0_i32_0 : i32, i32
  }
  func.func @transform_3(%arg0: i32) -> (i32, i32) {
    %c0_i32 = arith.constant 0 : i32
    %c0_i32_0 = arith.constant 0 : i32
    %c0_i32_1 = arith.constant 0 : i32
    return %c0_i32, %c0_i32_0 : i32, i32
  }
  func.func @transform_4(%arg0: i32) -> (i32, i32) {
    %c0_i32 = arith.constant 0 : i32
    %c0_i32_0 = arith.constant 0 : i32
    %c0_i32_1 = arith.constant 0 : i32
    return %c0_i32, %c0_i32_0 : i32, i32
  }
  func.func @transform_5(%arg0: i32) -> (i32, i32, i32) {
    %c0_i32 = arith.constant 0 : i32
    %c0_i32_0 = arith.constant 0 : i32
    %c0_i32_1 = arith.constant 0 : i32
    return %arg0, %c0_i32, %c0_i32_0 : i32, i32, i32
  }
  func.func @transform_6(%arg0: i32) -> (i32, i32, i32) {
    %c0_i32 = arith.constant 0 : i32
    %c0_i32_0 = arith.constant 0 : i32
    %c0_i32_1 = arith.constant 0 : i32
    return %arg0, %c0_i32, %c0_i32_0 : i32, i32, i32
  }
}

module attributes {stable_mosaic.version = 11 : i64} {
  func.func @_head_kernel(%arg0: i32, %arg1: memref<8x4x128xf32, #tpu.memory_space<vmem>>, %arg2: memref<1x128xf32, #tpu.memory_space<vmem>>, %arg3: memref<1x128xf32, #tpu.memory_space<vmem>>, %arg4: memref<4x128xf32, #tpu.memory_space<vmem>>, %arg5: memref<8x1x128xf32, #tpu.memory_space<vmem>>) attributes {dimension_semantics = [#tpu.dimension_semantics<parallel>], iteration_bounds = array<i64: 1>, scalar_prefetch = 0 : i64, scratch_operands = 0 : i64, tpu.core_type = #tpu.core_type<tc>, window_params = [{transform_indices = @transform_0, window_bounds = array<i64: 8, 4, 128>}, {pipeline_mode = #tpu.pipeline_mode<synchronous>, transform_indices = @transform_1, window_bounds = array<i64: 1, 128>}, {pipeline_mode = #tpu.pipeline_mode<synchronous>, transform_indices = @transform_2, window_bounds = array<i64: 1, 128>}, {pipeline_mode = #tpu.pipeline_mode<synchronous>, transform_indices = @transform_3, window_bounds = array<i64: 4, 128>}, {transform_indices = @transform_4, window_bounds = array<i64: 8, 1, 128>}]} {
    %c0 = arith.constant 0 : index
    %c0_0 = arith.constant 0 : index
    %c0_1 = arith.constant 0 : index
    %0 = vector.load %arg1[%c0, %c0_0, %c0_1] : memref<8x4x128xf32, #tpu.memory_space<vmem>>, vector<8x4x128xf32>
    %c0_2 = arith.constant 0 : index
    %c0_3 = arith.constant 0 : index
    %1 = vector.load %arg2[%c0_2, %c0_3] : memref<1x128xf32, #tpu.memory_space<vmem>>, vector<1x128xf32>
    %2 = vector.shape_cast %1 : vector<1x128xf32> to vector<1x1x128xf32>
    %3 = vector.broadcast %2 : vector<1x1x128xf32> to vector<8x4x128xf32>
    %4 = arith.mulf %0, %3 : vector<8x4x128xf32>
    %c0_4 = arith.constant 0 : index
    %c0_5 = arith.constant 0 : index
    %5 = vector.load %arg3[%c0_4, %c0_5] : memref<1x128xf32, #tpu.memory_space<vmem>>, vector<1x128xf32>
    %6 = vector.shape_cast %5 : vector<1x128xf32> to vector<1x1x128xf32>
    %7 = vector.broadcast %6 : vector<1x1x128xf32> to vector<8x4x128xf32>
    %8 = arith.addf %4, %7 : vector<8x4x128xf32>
    %cst = arith.constant 0.000000e+00 : f32
    %9 = vector.broadcast %cst : f32 to vector<8x4x128xf32>
    %10 = arith.cmpf ogt, %8, %9 : vector<8x4x128xf32>
    %cst_6 = arith.constant 2.000000e-01 : f32
    %11 = vector.broadcast %cst_6 : f32 to vector<8x4x128xf32>
    %12 = arith.mulf %11, %8 : vector<8x4x128xf32>
    %13 = arith.select %10, %8, %12 : vector<8x4x128xi1>, vector<8x4x128xf32>
    %c0_7 = arith.constant 0 : index
    %c0_8 = arith.constant 0 : index
    %14 = vector.load %arg4[%c0_7, %c0_8] : memref<4x128xf32, #tpu.memory_space<vmem>>, vector<4x128xf32>
    %15 = vector.shape_cast %14 : vector<4x128xf32> to vector<1x4x128xf32>
    %16 = vector.broadcast %15 : vector<1x4x128xf32> to vector<8x4x128xf32>
    %17 = arith.mulf %13, %16 : vector<8x4x128xf32>
    %cst_9 = arith.constant dense<0.000000e+00> : vector<8x128xf32>
    %18 = vector.multi_reduction <add>, %17, %cst_9 [1] : vector<8x4x128xf32> to vector<8x128xf32>
    %19 = vector.shape_cast %18 : vector<8x128xf32> to vector<8x1x128xf32>
    %c0_10 = arith.constant 0 : index
    %c0_11 = arith.constant 0 : index
    %c0_12 = arith.constant 0 : index
    %20 = vector.load %arg5[%c0_10, %c0_11, %c0_12] : memref<8x1x128xf32, #tpu.memory_space<vmem>>, vector<8x1x128xf32>
    tpu.vector_store %arg5[%c0_10, %c0_11, %c0_12], %19 {strides = array<i32>} : memref<8x1x128xf32, #tpu.memory_space<vmem>>, vector<8x1x128xf32>,
    return
  }
  func.func @transform_0(%arg0: i32) -> (i32, i32, i32) {
    %c0_i32 = arith.constant 0 : i32
    %c0_i32_0 = arith.constant 0 : i32
    %c0_i32_1 = arith.constant 0 : i32
    return %arg0, %c0_i32, %c0_i32_0 : i32, i32, i32
  }
  func.func @transform_1(%arg0: i32) -> (i32, i32) {
    %c0_i32 = arith.constant 0 : i32
    %c0_i32_0 = arith.constant 0 : i32
    %c0_i32_1 = arith.constant 0 : i32
    return %c0_i32, %c0_i32_0 : i32, i32
  }
  func.func @transform_2(%arg0: i32) -> (i32, i32) {
    %c0_i32 = arith.constant 0 : i32
    %c0_i32_0 = arith.constant 0 : i32
    %c0_i32_1 = arith.constant 0 : i32
    return %c0_i32, %c0_i32_0 : i32, i32
  }
  func.func @transform_3(%arg0: i32) -> (i32, i32) {
    %c0_i32 = arith.constant 0 : i32
    %c0_i32_0 = arith.constant 0 : i32
    %c0_i32_1 = arith.constant 0 : i32
    return %c0_i32, %c0_i32_0 : i32, i32
  }
  func.func @transform_4(%arg0: i32) -> (i32, i32, i32) {
    %c0_i32 = arith.constant 0 : i32
    %c0_i32_0 = arith.constant 0 : i32
    %c0_i32_1 = arith.constant 0 : i32
    return %arg0, %c0_i32, %c0_i32_0 : i32, i32, i32
  }
}

</mosaic_0001>

<bundles_post_ra>
// kernel: discriminator_forward.3
= control target key start
LH: loop header
LB: loop body
LE: loop exit
PB: predicated region body
PF: predicated region fallthrough
CT: control target
= control target key end

     0   :  { %vm88_vm0 = vcmask 1043456   ;;  %s270_s0 = inlined_call_operand.vmem [shape: f32[8,4,128], index: 0, kind: input, shape index: {}]   ;;  %s271_s1 = inlined_call_operand.vmem [shape: f32[1,128], index: 1, kind: input, shape index: {}]   ;;  %s272_s2 = inlined_call_operand.vmem [shape: f32[1,128], index: 2, kind: input, shape index: {}]   ;;  %s273_s3 = inlined_call_operand.vmem [shape: f32[4,128], index: 3, kind: input, shape index: {}]   ;;  %s274_s4 = inlined_call_operand.vmem [shape: f32[8,1,128], index: 4, kind: output, shape index: {}]  }
   0x1   :  { %v17_v0 = vld [vmem:[%s270_s0] sm:$0xf]  ;;  %v18_v4 = vld [vmem:[%s270_s0 + $0x4] sm:$0xf]  ;;  %v19_v5 = vld [vmem:[%s270_s0 + $0x8] sm:$0xf] }
   0x2   :  { %v157_v1 = vld [vmem:[%s271_s1] ss:$0 sm:$0xff]  ;;  %v20_v8 = vld [vmem:[%s270_s0 + $0xc] sm:$0xf]  ;;  %v21_v9 = vld [vmem:[%s270_s0 + $0x10] sm:$0xf] }
   0x3   :  { %v193_v2 = vld [vmem:[%s272_s2] ss:$0 sm:$0xff]  ;;  %v32_v3 = vmul.f32 %v157_v1, %v17_v0  ;;  %v33_v6 = vmul.f32 %v157_v1, %v18_v4  ;;  %v34_v7 = vmul.f32 %v157_v1, %v19_v5  ;;  %v22_v10 = vld [vmem:[%s270_s0 + $0x14] sm:$0xf]  ;;  %v35_v12 = vmul.f32 %v157_v1, %v20_v8  ;;  %v23_v15 = vld [vmem:[%s270_s0 + $0x18] sm:$0xf] }
   0x4   :  { %v36_v13 = vmul.f32 %v157_v1, %v21_v9  ;;  %v37_v14 = vmul.f32 %v157_v1, %v22_v10  ;;  %v24_v16 = vld [vmem:[%s270_s0 + $0x1c] sm:$0xf]  ;;  %v38_v19 = vmul.f32 %v157_v1, %v23_v15  ;;  %v222_v22 = vld [vmem:[%s273_s3] sm:$0xf] }
   0x5   :  { %v47_v11 = vadd.f32 %v193_v2, %v32_v3  ;;  %v48_v17 = vadd.f32 %v193_v2, %v33_v6  ;;  %v49_v18 = vadd.f32 %v193_v2, %v34_v7  ;;  %v39_v20 = vmul.f32 %v157_v1, %v24_v16 }
   0x6   :  { %v50_v23 = vadd.f32 %v193_v2, %v35_v12  ;;  %v51_v24 = vadd.f32 %v193_v2, %v36_v13  ;;  %v52_v36 = vadd.f32 %v193_v2, %v37_v14  ;;  %v53_v40 = vadd.f32 %v193_v2, %v38_v19 }
   0x7   :  { %vm55_vm1 = vcmp.gt.f32.partialorder %v47_v11, 0.0  ;;  %v63_v21 = vmul.f32 0.2, %v47_v11  ;;  %vm56_vm2 = vcmp.gt.f32.partialorder %v48_v17, 0.0  ;;  %v64_v25 = vmul.f32 0.2, %v48_v17 }
   0x8   :  { %vm57_vm3 = vcmp.gt.f32.partialorder %v49_v18, 0.0  ;;  %v65_v26 = vmul.f32 0.2, %v49_v18  ;;  %vm58_vm4 = vcmp.gt.f32.partialorder %v50_v23, 0.0  ;;  %v66_v28 = vmul.f32 0.2, %v50_v23 }
   0x9   :  { %v71_v27 = vsel %vm55_vm1, %v47_v11, %v63_v21  ;;  %vm59_vm5 = vcmp.gt.f32.partialorder %v51_v24, 0.0  ;;  %v72_v30 = vsel %vm56_vm2, %v48_v17, %v64_v25  ;;  %v67_v32 = vmul.f32 0.2, %v51_v24 }
   0xa   :  { %v80_v29 = vmul.f32 %v222_v22, %v71_v27  ;;  %v73_v31 = vsel %vm57_vm3, %v49_v18, %v65_v26  ;;  %v81_v33 = vmul.f32 %v222_v22, %v72_v30  ;;  %v74_v35 = vsel %vm58_vm4, %v50_v23, %v66_v28 }
   0xb   :  { %v82_v34 = vmul.f32 %v222_v22, %v73_v31  ;;  %v83_v38 = vmul.f32 %v222_v22, %v74_v35  ;;  %v75_v39 = vsel %vm59_vm5, %v51_v24, %v67_v32  ;;  %vm60_vm6 = vcmp.gt.f32.partialorder %v52_v36, 0.0 }
   0xc   :  { %v89_v37 = vsel %vm88_vm0, %v80_v29, 0.0  ;;  %v96_v42 = vsel %vm88_vm0, %v81_v33, 0.0  ;;  %v84_v44 = vmul.f32 %v222_v22, %v75_v39  ;;  %v68_v51 = vmul.f32 0.2, %v52_v36 }
   0xd   :  { %v90_v41 = vrot.slane %v89_v37, 4  ;;  %v103_v43 = vsel %vm88_vm0, %v82_v34, 0.0  ;;  %v97_v45 = vrot.slane %v96_v42, 4  ;;  %v110_v47 = vsel %vm88_vm0, %v83_v38, 0.0 }
   0xe   :  { %v104_v46 = vrot.slane %v103_v43, 4  ;;  %v111_v49 = vrot.slane %v110_v47, 4  ;;  %v117_v50 = vsel %vm88_vm0, %v84_v44, 0.0  ;;  %vm61_vm7 = vcmp.gt.f32.partialorder %v53_v40, 0.0 }
   0xf   :  { %v91_v48 = vadd.f32 %v90_v41, %v89_v37  ;;  %v98_v52 = vadd.f32 %v97_v45, %v96_v42  ;;  %v118_v54 = vrot.slane %v117_v50, 4  ;;  %v76_v57 = vsel %vm60_vm6, %v52_v36, %v68_v51 }
  0x10   :  { %v105_v53 = vadd.f32 %v104_v46, %v103_v43  ;;  %v112_v56 = vadd.f32 %v111_v49, %v110_v47  ;;  %v69_v58 = vmul.f32 0.2, %v53_v40  ;;  %v85_v62 = vmul.f32 %v222_v22, %v76_v57 }
  0x11   :  { %v92_v55 = vrot.slane %v91_v48, 2  ;;  %v99_v59 = vrot.slane %v98_v52, 2  ;;  %v119_v61 = vadd.f32 %v118_v54, %v117_v50  ;;  %v54_v3 = vadd.f32 %v193_v2, %v39_v20 }
  0x12   :  { %v106_v60 = vrot.slane %v105_v53, 2  ;;  %v113_v0 = vrot.slane %v112_v56, 2  ;;  %v77_v1 = vsel %vm61_vm7, %v53_v40, %v69_v58  ;;  %v124_v7 = vsel %vm88_vm0, %v85_v62, 0.0 }
  0x13   :  { %v93_v63 = vadd.f32 %v92_v55, %v91_v48  ;;  %v100_v4 = vadd.f32 %v99_v59, %v98_v52  ;;  %v120_v6 = vrot.slane %v119_v61, 2  ;;  %v125_v10 = vrot.slane %v124_v7, 4 }
  0x14   :  { %v107_v5 = vadd.f32 %v106_v60, %v105_v53  ;;  %v114_v9 = vadd.f32 %v113_v0, %v112_v56  ;;  %v86_v11 = vmul.f32 %v222_v22, %v77_v1  ;;  %vm62_vm8 = vcmp.gt.f32.partialorder %v54_v3, 0.0 }
  0x15   :  { %v94_v8 = vrot.slane %v93_v63, 1  ;;  %v101_v12 = vrot.slane %v100_v4, 1  ;;  %v121_v14 = vadd.f32 %v120_v6, %v119_v61  ;;  %v126_v17 = vadd.f32 %v125_v10, %v124_v7 }
  0x16   :  { %v108_v13 = vrot.slane %v107_v5, 1  ;;  %v115_v16 = vrot.slane %v114_v9, 1  ;;  %v131_v18 = vsel %vm88_vm0, %v86_v11, 0.0  ;;  %v70_v25 = vmul.f32 0.2, %v54_v3 }
  0x17   :  { %v95_v15 = vadd.f32 %v94_v8, %v93_v63  ;;  %v102_v2 = vadd.f32 %v101_v12, %v100_v4  ;;  %v122_v20 = vrot.slane %v121_v14, 1  ;;  %v132_v21 = vrot.slane %v131_v18, 4 }
  0x18   :  { %v109_v19 = vadd.f32 %v108_v13, %v107_v5  ;;  %v116_v23 = vadd.f32 %v115_v16, %v114_v9  ;;  %v127_v24 = vrot.slane %v126_v17, 2  ;;  %v78_v29 = vsel %vm62_vm8, %v54_v3, %v70_v25 }
  0x19   :  { %145 = vst [vmem:[%s274_s4] sm:$0x1] %v95_v15  ;;  %146 = vst [vmem:[%s274_s4 + $0x1] sm:$0x1] %v102_v2  ;;  %v123_v26 = vadd.f32 %v122_v20, %v121_v14  ;;  %v133_v27 = vadd.f32 %v132_v21, %v131_v18  ;;  %v87_v31 = vmul.f32 %v222_v22, %v78_v29 }
  0x1a   :  { %147 = vst [vmem:[%s274_s4 + $0x2] sm:$0x1] %v109_v19  ;;  %148 = vst [vmem:[%s274_s4 + $0x3] sm:$0x1] %v116_v23  ;;  %v128_v28 = vadd.f32 %v127_v24, %v126_v17 }
  0x1b   :  { %149 = vst [vmem:[%s274_s4 + $0x4] sm:$0x1] %v123_v26  ;;  %v134_v30 = vrot.slane %v133_v27, 2  ;;  %v138_v34 = vsel %vm88_vm0, %v87_v31, 0.0 }
  0x1c   :  { %v129_v32 = vrot.slane %v128_v28, 1  ;;  %v139_v36 = vrot.slane %v138_v34, 4 }
  0x1d   :  { %v135_v33 = vadd.f32 %v134_v30, %v133_v27 }
  0x1e   :  { %v130_v35 = vadd.f32 %v129_v32, %v128_v28  ;;  %v140_v38 = vadd.f32 %v139_v36, %v138_v34 }
  0x1f   :  { %v136_v37 = vrot.slane %v135_v33, 1 }
  0x20   :  { %150 = vst [vmem:[%s274_s4 + $0x5] sm:$0x1] %v130_v35  ;;  %v141_v40 = vrot.slane %v140_v38, 2 }
  0x21   :  { %v137_v39 = vadd.f32 %v136_v37, %v135_v33 }
  0x22   :  { %v142_v41 = vadd.f32 %v141_v40, %v140_v38 }
  0x23   :  { %151 = vst [vmem:[%s274_s4 + $0x6] sm:$0x1] %v137_v39 }
  0x24   :  { %v143_v22 = vrot.slane %v142_v41, 1 }
  0x26   :  { %v144_v42 = vadd.f32 %v143_v22, %v142_v41 }
  0x28   :  { %152 = vst [vmem:[%s274_s4 + $0x7] sm:$0x1] %v144_v42 }

// kernel: discriminator_forward.2
= control target key start
LH: loop header
LB: loop body
LE: loop exit
PB: predicated region body
PF: predicated region fallthrough
CT: control target
= control target key end

     0   :  { %vm56_vm0 = vcmask 392192   ;;  %vm210_vm8 = vcmask 1040384   ;;  %vm388_vm10 = vcmask 1043456   ;;  %s860_s1 = inlined_call_operand.vmem [shape: f32[48,128], index: 1, kind: input, shape index: {}]   ;;  %s861_s0 = inlined_call_operand.vmem [shape: f32[8,4,48], index: 0, kind: input, shape index: {}]   ;;  %s862_s3 = inlined_call_operand.vmem [shape: f32[256,128], index: 3, kind: input, shape index: {}]   ;;  %s863_s2 = inlined_call_operand.vmem [shape: f32[1,128], index: 2, kind: input, shape index: {}]   ;;  %s864_s4 = inlined_call_operand.vmem [shape: f32[1,128], index: 4, kind: input, shape index: {}]   ;;  %s865_s5 = inlined_call_operand.vmem [shape: f32[8,4,128], index: 5, kind: output, shape index: {0}]   ;;  %s866_s6 = inlined_call_operand.vmem [shape: f32[1,2,128], index: 6, kind: output, shape index: {1}]  }
   0x1   :  { %v35_v0 = vld [vmem:[%s860_s1 + $0x28] sm:$0xff]  ;;  %v34_v1 = vld [vmem:[%s860_s1 + $0x20] sm:$0xff]  ;;  %v33_v2 = vld [vmem:[%s860_s1 + $0x18] sm:$0xff] }
   0x2   :  { %609 = vmatprep.subr.mxu0 %v35_v0  ;;  %v627_v3 = vld [vmem:[%s861_s0] sm:$0xff]   ;;  %v32_v4 = vld [vmem:[%s860_s1 + $0x10] sm:$0xff]  ;;  %v31_v5 = vld [vmem:[%s860_s1 + $0x8] sm:$0xff] }
   0x3   :  { %610 = vmatpush3.msra.mxu0 %v35_v0  ;;  %621 = vmatprep.mubr.msk.f32.mxu0 %vm56_vm0, %v627_v3  ;;  %v250_v6 = vld [vmem:[%s862_s3 + $0xf8] sm:$0xff]  ;;  %v249_v8 = vld [vmem:[%s862_s3 + $0xf0] sm:$0xff]  ;;  %v30_v10 = vld [vmem:[%s860_s1] sm:$0xff] }
   0x4   :  { %611 = vmatprep.subr.mxu0 %v34_v1  ;;  %v234_v7 = vld [vmem:[%s862_s3 + $0x78] sm:$0xff]  ;;  %565 = vmatprep.subr.mxu1 %v250_v6  ;;  %v233_v9 = vld [vmem:[%s862_s3 + $0x70] sm:$0xff]  ;;  %v248_v11 = vld [vmem:[%s862_s3 + $0xe8] sm:$0xff] }
   0x5   :  { %612 = vmatpush3.msra.mxu0 %v34_v1  ;;  %566 = vmatpush3.msra.mxu1 %v234_v7  ;;  %v628_v12 = vld [vmem:[%s861_s0 + $0x8] sm:$0xff]   ;;  %v629_v14 = vld [vmem:[%s861_s0 + $0x10] sm:$0xff]   ;;  %v247_v15 = vld [vmem:[%s862_s3 + $0xe0] sm:$0xff] }
   0x6   :  { %613 = vmatprep.subr.mxu0 %v33_v2  ;;  %567 = vmatprep.subr.mxu1 %v249_v8  ;;  %v232_v13 = vld [vmem:[%s862_s3 + $0x68] sm:$0xff]  ;;  %v231_v16 = vld [vmem:[%s862_s3 + $0x60] sm:$0xff]  ;;  %v246_v17 = vld [vmem:[%s862_s3 + $0xd8] sm:$0xff] }
   0x7   :  { %614 = vmatpush3.msra.mxu0 %v33_v2  ;;  %568 = vmatpush3.msra.mxu1 %v233_v9  ;;  %v630_v18 = vld [vmem:[%s861_s0 + $0x18] sm:$0xff]   ;;  %v245_v20 = vld [vmem:[%s862_s3 + $0xd0] sm:$0xff]  ;;  %v244_v22 = vld [vmem:[%s862_s3 + $0xc8] sm:$0xff] }
   0x8   :  { %615 = vmatprep.subr.mxu0 %v32_v4  ;;  %569 = vmatprep.subr.mxu1 %v248_v11  ;;  %v230_v19 = vld [vmem:[%s862_s3 + $0x58] sm:$0xff]  ;;  %v229_v21 = vld [vmem:[%s862_s3 + $0x50] sm:$0xff]  ;;  %v228_v23 = vld [vmem:[%s862_s3 + $0x48] sm:$0xff] }
   0x9   :  { %616 = vmatpush3.msra.mxu0 %v32_v4  ;;  %570 = vmatpush3.msra.mxu1 %v232_v13  ;;  %v243_v24 = vld [vmem:[%s862_s3 + $0xc0] sm:$0xff]  ;;  %v242_v26 = vld [vmem:[%s862_s3 + $0xb8] sm:$0xff]  ;;  %v241_v28 = vld [vmem:[%s862_s3 + $0xb0] sm:$0xff] }
   0xa   :  { %617 = vmatprep.subr.mxu0 %v31_v5  ;;  %571 = vmatprep.subr.mxu1 %v247_v15  ;;  %v227_v25 = vld [vmem:[%s862_s3 + $0x40] sm:$0xff]  ;;  %v226_v27 = vld [vmem:[%s862_s3 + $0x38] sm:$0xff]  ;;  %v225_v29 = vld [vmem:[%s862_s3 + $0x30] sm:$0xff] }
   0xb   :  { %618 = vmatpush3.msra.mxu0 %v31_v5  ;;  %572 = vmatpush3.msra.mxu1 %v231_v16  ;;  %v240_v30 = vld [vmem:[%s862_s3 + $0xa8] sm:$0xff]  ;;  %v239_v32 = vld [vmem:[%s862_s3 + $0xa0] sm:$0xff]  ;;  %v238_v34 = vld [vmem:[%s862_s3 + $0x98] sm:$0xff] }
   0xc   :  { %619 = vmatprep.subr.mxu0 %v30_v10  ;;  %573 = vmatprep.subr.mxu1 %v246_v17  ;;  %v224_v31 = vld [vmem:[%s862_s3 + $0x28] sm:$0xff]  ;;  %v223_v33 = vld [vmem:[%s862_s3 + $0x20] sm:$0xff]  ;;  %v222_v35 = vld [vmem:[%s862_s3 + $0x18] sm:$0xff] }
   0xd   :  { %620 = vmatpush3.msra.mxu0 %v30_v10  ;;  %574 = vmatpush3.msra.mxu1 %v230_v19  ;;  %v237_v36 = vld [vmem:[%s862_s3 + $0x90] sm:$0xff]  ;;  %v236_v38 = vld [vmem:[%s862_s3 + $0x88] sm:$0xff]  ;;  %v235_v40 = vld [vmem:[%s862_s3 + $0x80] sm:$0xff] }
   0xe   :  { %622 = vmatmul.mubr.msk.f32.vlgmr.msra.gmra.mxu0 %vm56_vm0, %v628_v12  ;;  %575 = vmatprep.subr.mxu1 %v245_v20  ;;  %v221_v37 = vld [vmem:[%s862_s3 + $0x10] sm:$0xff]  ;;  %v220_v39 = vld [vmem:[%s862_s3 + $0x8] sm:$0xff]  ;;  %v219_v41 = vld [vmem:[%s862_s3] sm:$0xff] }
   0xf   :  { %624 = vmatprep.mubr.msk.f32.mxu0 %vm56_vm0, %v629_v14  ;;  %576 = vmatpush3.msra.mxu1 %v229_v21  ;;  %v541_v42 = vld [vmem:[%s863_s2] ss:$0 sm:$0xff] }
  0x10   :  { %577 = vmatprep.subr.mxu1 %v244_v22  ;;  %v54_v43 = vcombine.low %v541_v42, %v541_v42 }
  0x11   :  { %578 = vmatpush3.msra.mxu1 %v228_v23 }
  0x12   :  { %625 = vmatmul.mubr.msk.f32.gmra.mxu0 %vm56_vm0, %v630_v18  ;;  %579 = vmatprep.subr.mxu1 %v243_v24 }
  0x13   :  { %580 = vmatpush3.msra.mxu1 %v227_v25 }
  0x14   :  { %581 = vmatprep.subr.mxu1 %v242_v26 }
  0x15   :  { %582 = vmatpush3.msra.mxu1 %v226_v27 }
  0x16   :  { %583 = vmatprep.subr.mxu1 %v241_v28 }
  0x17   :  { %584 = vmatpush3.msra.mxu1 %v225_v29 }
  0x18   :  { %585 = vmatprep.subr.mxu1 %v240_v30 }
  0x19   :  { %586 = vmatpush3.msra.mxu1 %v224_v31 }
  0x1a   :  { %587 = vmatprep.subr.mxu1 %v239_v32  ;;  %v546_v32 = vld [vmem:[%s864_s4] ss:$0 sm:$0xff] }
  0x1b   :  { %588 = vmatpush3.msra.mxu1 %v223_v33 }
  0x1c   :  { %589 = vmatprep.subr.mxu1 %v238_v34  ;;  %v810_v34 = vcombine.low %v546_v32, %v546_v32 }
  0x1d   :  { %590 = vmatpush3.msra.mxu1 %v222_v35 }
  0x1e   :  { %591 = vmatprep.subr.mxu1 %v237_v36 }
  0x1f   :  { %592 = vmatpush3.msra.mxu1 %v221_v37 }
  0x20   :  { %593 = vmatprep.subr.mxu1 %v236_v38 }
  0x21   :  { %594 = vmatpush3.msra.mxu1 %v220_v39 }
  0x22   :  { %595 = vmatprep.subr.mxu1 %v235_v40 }
  0x23   :  { %596 = vmatpush3.msra.mxu1 %v219_v41 }
  0xce   :  { %v623_v44 = vpop.f32.mrf.mxu0 }
  0xcf   :  { %v137_v45 = vadd.f32 %v623_v44, %v54_v43 }
  0xd0   :  { %v131_v46 = vpop.f32.mrf.mxu0 }
  0xd1   :  { %v155_v47 = vcombine.high %v137_v45, %v137_v45  ;;  %v172_v48 = vmul.f32 0.2, %v137_v45  ;;  %v132_v49 = vadd.f32 %v131_v46, %v54_v43  ;;  %vm164_vm1 = vcmp.gt.f32.partialorder %v137_v45, 0.0 }
  0xd2   :  { %v626_v50 = vpop.f32.mrf.mxu0 }
  0xd3   :  { %v147_v51 = vadd.f32 %v626_v50, %v54_v43  ;;  %v154_v52 = vcombine.high %v132_v49, %v132_v49  ;;  %vm162_vm2 = vcmp.gt.f32.partialorder %v132_v49, 0.0  ;;  %v170_v53 = vmul.f32 0.2, %v132_v49 }
  0xd4   :  { %v141_v54 = vpop.f32.mrf.mxu0  ;;  %vm165_vm3 = vcmp.gt.f32.partialorder %v155_v47, 0.0  ;;  %v173_v55 = vmul.f32 0.2, %v155_v47  ;;  %v180_v58 = vsel %vm164_vm1, %v137_v45, %v172_v48 }
  0xd5   :  { %v157_v56 = vcombine.high %v147_v51, %v147_v51  ;;  %v142_v57 = vadd.f32 %v141_v54, %v54_v43  ;;  %vm163_vm4 = vcmp.gt.f32.partialorder %v154_v52, 0.0  ;;  %v171_v59 = vmul.f32 0.2, %v154_v52 }
  0xd6   :  { %v178_v60 = vsel %vm162_vm2, %v132_v49, %v170_v53  ;;  %v181_v61 = vsel %vm165_vm3, %v155_v47, %v173_v55  ;;  %v176_v1 = vmul.f32 0.2, %v147_v51  ;;  %vm168_vm6 = vcmp.gt.f32.partialorder %v147_v51, 0.0 }
  0xd7   :  { %v156_v62 = vcombine.high %v142_v57, %v142_v57  ;;  %vm166_vm5 = vcmp.gt.f32.partialorder %v142_v57, 0.0  ;;  %v174_v63 = vmul.f32 0.2, %v142_v57  ;;  %v194_v0 = vrot.slane %v178_v60, 7 }
  0xd8   :  { %v179_v2 = vsel %vm163_vm4, %v154_v52, %v171_v59  ;;  %v197_v3 = vrot.slane %v181_v61, 7  ;;  %v196_v5 = vrot.slane %v180_v58, 7  ;;  %vm169_vm9 = vcmp.gt.f32.partialorder %v157_v56, 0.0 }
  0xd9   :  { %v195_v4 = vrot.slane %v179_v2, 7  ;;  %vm167_vm7 = vcmp.gt.f32.partialorder %v156_v62, 0.0  ;;  %v175_v6 = vmul.f32 0.2, %v156_v62  ;;  %v182_v7 = vsel %vm166_vm5, %v142_v57, %v174_v63 }
  0xda   :  { %v211_v8 = vsel %vm210_vm8, 0.0, %v194_v0  ;;  %v214_v10 = vsel %vm210_vm8, 0.0, %v197_v3  ;;  %v177_v13 = vmul.f32 0.2, %v157_v56  ;;  %v184_v14 = vsel %vm168_vm6, %v147_v51, %v176_v1 }
  0xdb   :  { %v212_v9 = vsel %vm210_vm8, 0.0, %v195_v4  ;;  %v183_v12 = vsel %vm167_vm7, %v156_v62, %v175_v6  ;;  %v547_v15 = vcombine.low %v178_v60, %v179_v2  ;;  %v213_v16 = vsel %vm210_vm8, 0.0, %v196_v5 }
  0xdc   :  { %v548_v11 = vcombine.low %v211_v8, %v212_v9  ;;  %v198_v17 = vrot.slane %v182_v7, 7  ;;  %v199_v18 = vrot.slane %v183_v12, 7  ;;  %v550_v19 = vcombine.low %v213_v16, %v214_v10 }
  0xdd   :  { %v185_v20 = vsel %vm169_vm9, %v157_v56, %v177_v13  ;;  %v200_v22 = vrot.slane %v184_v14, 7  ;;  %v549_v24 = vcombine.low %v180_v58, %v181_v61  ;;  %v551_v29 = vcombine.low %v182_v7, %v183_v12 }
  0xde   :  { %355 = vmatprep.mubr.f32.mxu1 %v548_v11  ;;  %v216_v21 = vsel %vm210_vm8, 0.0, %v199_v18  ;;  %v201_v23 = vrot.slane %v185_v20, 7  ;;  %v215_v25 = vsel %vm210_vm8, 0.0, %v198_v17  ;;  %v553_v31 = vcombine.low %v184_v14, %v185_v20 }
  0xdf   :  { %356 = vmatmul.mubr.f32.vlgmr.msra.gmra.mxu1 %v547_v15  ;;  %v552_v26 = vcombine.low %v215_v25, %v216_v21  ;;  %v217_v27 = vsel %vm210_vm8, 0.0, %v200_v22 }
  0xe0   :  { %360 = vmatprep.mubr.f32.mxu1 %v550_v19  ;;  %v218_v28 = vsel %vm210_vm8, 0.0, %v201_v23 }
  0xe1   :  { %v554_v30 = vcombine.low %v217_v27, %v218_v28 }
  0xe3   :  { %361 = vmatmul.mubr.f32.gmra.mxu1 %v549_v24 }
  0xe4   :  { %365 = vmatprep.mubr.f32.mxu1 %v552_v26 }
  0xe7   :  { %366 = vmatmul.mubr.f32.gmra.mxu1 %v551_v29 }
  0xe8   :  { %370 = vmatprep.mubr.f32.mxu1 %v554_v30 }
  0xeb   :  { %371 = vmatmul.mubr.f32.gmra.mxu1 %v553_v31 }
 0x19f   :  { %v597_v33 = vpop.f32.mrf.mxu1 }
 0x1a1   :  { %v598_v35 = vpop.f32.mrf.mxu1 }
 0x1a2   :  { %v599_v36 = vadd.f32 %v598_v35, %v597_v33 }
 0x1a3   :  { %v600_v37 = vpop.f32.mrf.mxu1 }
 0x1a4   :  { %v358_v38 = vadd.f32 %v599_v36, %v810_v34 }
 0x1a5   :  { %v601_v39 = vpop.f32.mrf.mxu1 }
 0x1a6   :  { %v380_v40 = vcombine.high %v358_v38, %v358_v38  ;;  %v389_v41 = vsel %vm388_vm10, %v358_v38, 0.0  ;;  %v452_v42 = vmul.f32 %v358_v38, %v358_v38  ;;  %525 = vst [vmem:[%s865_s5] sm:$0xf] %v358_v38  ;;  %v602_v43 = vadd.f32 %v601_v39, %v600_v37 }
 0x1a7   :  { %v390_v44 = vrot.slane %v389_v41, 4  ;;  %v603_v45 = vpop.f32.mrf.mxu1 }
 0x1a8   :  { %v396_v46 = vsel %vm388_vm10, %v380_v40, 0.0  ;;  %v453_v47 = vmul.f32 %v380_v40, %v380_v40  ;;  %v460_v48 = vsel %vm388_vm10, %v452_v42, 0.0  ;;  %526 = vst [vmem:[%s865_s5 + $0x4] sm:$0xf] %v380_v40  ;;  %v363_v49 = vadd.f32 %v602_v43, %v810_v34 }
 0x1a9   :  { %v391_v50 = vadd.f32 %v390_v44, %v389_v41  ;;  %v397_v51 = vrot.slane %v396_v46, 4  ;;  %v461_v52 = vrot.slane %v460_v48, 4  ;;  %v604_v57 = vpop.f32.mrf.mxu1 }
 0x1aa   :  { %v467_v53 = vsel %vm388_vm10, %v453_v47, 0.0  ;;  %v381_v54 = vcombine.high %v363_v49, %v363_v49  ;;  %v403_v55 = vsel %vm388_vm10, %v363_v49, 0.0  ;;  %v454_v56 = vmul.f32 %v363_v49, %v363_v49  ;;  %527 = vst [vmem:[%s865_s5 + $0x8] sm:$0xf] %v363_v49 }
 0x1ab   :  { %v392_v58 = vrot.slane %v391_v50, 2  ;;  %v398_v59 = vadd.f32 %v397_v51, %v396_v46  ;;  %v462_v60 = vadd.f32 %v461_v52, %v460_v48  ;;  %v468_v61 = vrot.slane %v467_v53, 4  ;;  %v606_v10 = vpop.f32.mrf.mxu1 }
 0x1ac   :  { %v404_v62 = vrot.slane %v403_v55, 4  ;;  %v410_v63 = vsel %vm388_vm10, %v381_v54, 0.0  ;;  %v455_v0 = vmul.f32 %v381_v54, %v381_v54  ;;  %v474_v1 = vsel %vm388_vm10, %v454_v56, 0.0  ;;  %528 = vst [vmem:[%s865_s5 + $0xc] sm:$0xf] %v381_v54 }
 0x1ad   :  { %v393_v2 = vadd.f32 %v392_v58, %v391_v50  ;;  %v399_v3 = vrot.slane %v398_v59, 2  ;;  %v463_v4 = vrot.slane %v462_v60, 2  ;;  %v469_v5 = vadd.f32 %v468_v61, %v467_v53  ;;  %v607_v27 = vpop.f32.mrf.mxu1 }
 0x1ae   :  { %v405_v6 = vadd.f32 %v404_v62, %v403_v55  ;;  %v411_v7 = vrot.slane %v410_v63, 4  ;;  %v475_v8 = vrot.slane %v474_v1, 4  ;;  %v481_v9 = vsel %vm388_vm10, %v455_v0, 0.0 }
 0x1af   :  { %v394_v11 = vrot.slane %v393_v2, 1  ;;  %v400_v12 = vadd.f32 %v399_v3, %v398_v59  ;;  %v464_v13 = vadd.f32 %v463_v4, %v462_v60  ;;  %v470_v14 = vrot.slane %v469_v5, 2 }
 0x1b0   :  { %v406_v15 = vrot.slane %v405_v6, 2  ;;  %v412_v16 = vadd.f32 %v411_v7, %v410_v63  ;;  %v476_v17 = vadd.f32 %v475_v8, %v474_v1  ;;  %v482_v18 = vrot.slane %v481_v9, 4 }
 0x1b1   :  { %v395_v19 = vadd.f32 %v394_v11, %v393_v2  ;;  %v401_v20 = vrot.slane %v400_v12, 1  ;;  %v465_v21 = vrot.slane %v464_v13, 1  ;;  %v471_v22 = vadd.f32 %v470_v14, %v469_v5 }
 0x1b2   :  { %v407_v23 = vadd.f32 %v406_v15, %v405_v6  ;;  %v413_v24 = vrot.slane %v412_v16, 2  ;;  %v477_v25 = vrot.slane %v476_v17, 2  ;;  %v483_v26 = vadd.f32 %v482_v18, %v481_v9 }
 0x1b3   :  { %v402_v28 = vadd.f32 %v401_v20, %v400_v12  ;;  %v466_v29 = vadd.f32 %v465_v21, %v464_v13  ;;  %v472_v30 = vrot.slane %v471_v22, 1  ;;  %v605_v31 = vadd.f32 %v604_v57, %v603_v45 }
 0x1b4   :  { %v408_v32 = vrot.slane %v407_v23, 1  ;;  %v414_v33 = vadd.f32 %v413_v24, %v412_v16  ;;  %v478_v35 = vadd.f32 %v477_v25, %v476_v17  ;;  %v484_v36 = vrot.slane %v483_v26, 2 }
 0x1b5   :  { %v445_v37 = vadd.f32 %v402_v28, %v395_v19  ;;  %v473_v38 = vadd.f32 %v472_v30, %v471_v22  ;;  %v368_v39 = vadd.f32 %v605_v31, %v810_v34  ;;  %v608_v40 = vadd.f32 %v607_v27, %v606_v10 }
 0x1b6   :  { %v409_v41 = vadd.f32 %v408_v32, %v407_v23  ;;  %v415_v42 = vrot.slane %v414_v33, 1  ;;  %v479_v43 = vrot.slane %v478_v35, 1  ;;  %v485_v44 = vadd.f32 %v484_v36, %v483_v26 }
 0x1b7   :  { %v516_v46 = vadd.f32 %v473_v38, %v466_v29  ;;  %v382_v47 = vcombine.high %v368_v39, %v368_v39  ;;  %v417_v48 = vsel %vm388_vm10, %v368_v39, 0.0  ;;  %v456_v49 = vmul.f32 %v368_v39, %v368_v39  ;;  %529 = vst [vmem:[%s865_s5 + $0x10] sm:$0xf] %v368_v39 }
 0x1b8   :  { %v416_v45 = vadd.f32 %v415_v42, %v414_v33  ;;  %v446_v50 = vadd.f32 %v445_v37, %v409_v41  ;;  %v480_v51 = vadd.f32 %v479_v43, %v478_v35  ;;  %v486_v52 = vrot.slane %v485_v44, 1 }
 0x1b9   :  { %v418_v53 = vrot.slane %v417_v48, 4  ;;  %v424_v54 = vsel %vm388_vm10, %v382_v47, 0.0  ;;  %v457_v55 = vmul.f32 %v382_v47, %v382_v47  ;;  %v488_v56 = vsel %vm388_vm10, %v456_v49, 0.0  ;;  %530 = vst [vmem:[%s865_s5 + $0x14] sm:$0xf] %v382_v47 }
 0x1ba   :  { %v487_v57 = vadd.f32 %v486_v52, %v485_v44  ;;  %v517_v58 = vadd.f32 %v516_v46, %v480_v51  ;;  %v425_v59 = vrot.slane %v424_v54, 4  ;;  %v489_v61 = vrot.slane %v488_v56, 4 }
 0x1bb   :  { %v419_v60 = vadd.f32 %v418_v53, %v417_v48  ;;  %v495_v62 = vsel %vm388_vm10, %v457_v55, 0.0  ;;  %v373_v63 = vadd.f32 %v608_v40, %v810_v34  ;;  %v447_v1 = vadd.f32 %v446_v50, %v416_v45 }
 0x1bc   :  { %v426_v0 = vadd.f32 %v425_v59, %v424_v54  ;;  %v496_v2 = vrot.slane %v495_v62, 4  ;;  %v518_v3 = vadd.f32 %v517_v58, %v487_v57  ;;  %v490_v5 = vadd.f32 %v489_v61, %v488_v56 }
 0x1bd   :  { %v420_v4 = vrot.slane %v419_v60, 2  ;;  %v383_v6 = vcombine.high %v373_v63, %v373_v63  ;;  %v431_v7 = vsel %vm388_vm10, %v373_v63, 0.0  ;;  %531 = vst [vmem:[%s865_s5 + $0x18] sm:$0xf] %v373_v63  ;;  %v458_v11 = vmul.f32 %v373_v63, %v373_v63 }
 0x1be   :  { %v427_v8 = vrot.slane %v426_v0, 2  ;;  %v497_v9 = vadd.f32 %v496_v2, %v495_v62  ;;  %v432_v10 = vrot.slane %v431_v7, 4  ;;  %v491_v13 = vrot.slane %v490_v5, 2 }
 0x1bf   :  { %v421_v12 = vadd.f32 %v420_v4, %v419_v60  ;;  %v438_v34 = vsel %vm388_vm10, %v383_v6, 0.0  ;;  %v459_v14 = vmul.f32 %v383_v6, %v383_v6  ;;  %532 = vst [vmem:[%s865_s5 + $0x1c] sm:$0xf] %v383_v6  ;;  %v502_v21 = vsel %vm388_vm10, %v458_v11, 0.0 }
 0x1c0   :  { %v428_v15 = vadd.f32 %v427_v8, %v426_v0  ;;  %v498_v16 = vrot.slane %v497_v9, 2  ;;  %v433_v17 = vadd.f32 %v432_v10, %v431_v7  ;;  %v439_v18 = vrot.slane %v438_v34, 4 }
 0x1c1   :  { %v422_v19 = vrot.slane %v421_v12, 1  ;;  %v492_v20 = vadd.f32 %v491_v13, %v490_v5  ;;  %v509_v22 = vsel %vm388_vm10, %v459_v14, 0.0  ;;  %v503_v29 = vrot.slane %v502_v21, 4 }
 0x1c2   :  { %v429_v23 = vrot.slane %v428_v15, 1  ;;  %v499_v24 = vadd.f32 %v498_v16, %v497_v9  ;;  %v434_v25 = vrot.slane %v433_v17, 2  ;;  %v440_v26 = vadd.f32 %v439_v18, %v438_v34 }
 0x1c3   :  { %v423_v27 = vadd.f32 %v422_v19, %v421_v12  ;;  %v493_v28 = vrot.slane %v492_v20, 1  ;;  %v510_v30 = vrot.slane %v509_v22, 4  ;;  %v504_v38 = vadd.f32 %v503_v29, %v502_v21 }
 0x1c4   :  { %v430_v31 = vadd.f32 %v429_v23, %v428_v15  ;;  %v500_v32 = vrot.slane %v499_v24, 1  ;;  %v435_v33 = vadd.f32 %v434_v25, %v433_v17  ;;  %v441_v35 = vrot.slane %v440_v26, 2 }
 0x1c5   :  { %v448_v36 = vadd.f32 %v447_v1, %v423_v27  ;;  %v494_v37 = vadd.f32 %v493_v28, %v492_v20  ;;  %v511_v39 = vadd.f32 %v510_v30, %v509_v22  ;;  %v505_v44 = vrot.slane %v504_v38, 2 }
 0x1c6   :  { %v436_v40 = vrot.slane %v435_v33, 1  ;;  %v442_v41 = vadd.f32 %v441_v35, %v440_v26  ;;  %v501_v42 = vadd.f32 %v500_v32, %v499_v24 }
 0x1c7   :  { %v519_v43 = vadd.f32 %v518_v3, %v494_v37  ;;  %v512_v46 = vrot.slane %v511_v39, 2  ;;  %v449_v47 = vadd.f32 %v448_v36, %v430_v31  ;;  %v506_v45 = vadd.f32 %v505_v44, %v504_v38 }
 0x1c8   :  { %v437_v48 = vadd.f32 %v436_v40, %v435_v33  ;;  %v443_v49 = vrot.slane %v442_v41, 1 }
 0x1c9   :  { %v513_v50 = vadd.f32 %v512_v46, %v511_v39  ;;  %v507_v51 = vrot.slane %v506_v45, 1  ;;  %v520_v53 = vadd.f32 %v519_v43, %v501_v42 }
 0x1ca   :  { %v444_v54 = vadd.f32 %v443_v49, %v442_v41  ;;  %v450_v55 = vadd.f32 %v449_v47, %v437_v48 }
 0x1cb   :  { %v514_v52 = vrot.slane %v513_v50, 1  ;;  %v508_v56 = vadd.f32 %v507_v51, %v506_v45 }
 0x1cc   :  { %v451_v59 = vadd.f32 %v450_v55, %v444_v54 }
 0x1cd   :  { %v515_v57 = vadd.f32 %v514_v52, %v513_v50  ;;  %v521_v58 = vadd.f32 %v520_v53, %v508_v56 }
 0x1cf   :  { %v522_v60 = vadd.f32 %v521_v58, %v515_v57 }
 0x1d1   :  { %v523_v61 = vsel %vm210_vm8, %v451_v59, %v522_v60 }
 0x1d2   :  { %524 = vst [vmem:[%s866_s6] sm:$0x3] %v523_v61 }

</bundles_post_ra>
